<compile_context>
chip_gen: v7x
topology: tpu7x:2x2x1
jax: 0.10.0
libtpu: 0.0.40
codegen_flags: <defaults>
</compile_context>

<pallas_src>
import numpy as np

import jax
import jax.numpy as jnp
from jax import lax
from jax.experimental import pallas as pl
from jax.experimental.pallas import tpu as pltpu

_BN_EPS = 1e-5


# ---------------------------------------------------------------------------
# In-kernel helpers (traced inside Pallas kernel bodies)
# ---------------------------------------------------------------------------
def _s2d_conv(z, w2, n, ho, wo, c4, cout):
    """3x3 stride-2 conv on a space-to-depth input, as 4 MXU matmuls.

    z : (n, ho, wo, c4) f32 value  (c4 = 4*Cin, phase-major channel packing)
    w2: (2, 2, c4, cout) bf16 value (phase/shift-regrouped, BN scale folded)
    returns (n*ho*wo, cout) f32
    """
    # Pad once (one zero row on top, one zero col on the left), then take 4
    # static slices -- no per-tap concatenate-of-zeros copies.
    zp = jnp.concatenate([jnp.zeros((n, 1, wo, c4), z.dtype), z], axis=1)
    zp = jnp.concatenate([jnp.zeros((n, ho + 1, 1, c4), z.dtype), zp], axis=2)
    acc = jnp.zeros((n * ho * wo, cout), jnp.float32)
    for rs in (0, 1):          # row shift rs - 1 in {-1, 0}
        for cs in (0, 1):      # col shift cs - 1 in {-1, 0}
            tap = zp[:, rs:rs + ho, cs:cs + wo, :].reshape(n * ho * wo, c4)
            acc = acc + jnp.dot(tap.astype(jnp.bfloat16), w2[rs, cs],
                                preferred_element_type=jnp.float32)
    return acc


def _make_fuse_kernel(plan, n, s_out, c_out):
    """Build the fused kernel for one output branch.

    plan: static list of path descriptors, in the same order the corresponding
          inputs are passed to pallas_call:
            {"kind": "up",   "s_in": H_j*W_j}                   -> x2d, wf, U, b
            {"kind": "down", "ho": H_i, "wo": W_i, "c4": 4*Cin} -> z, w2, b
    """
    def kernel(*refs):
        out_ref = refs[-1]
        acc = refs[0][...].astype(jnp.float32)          # (n*s_out, c_out) residual
        r = 1
        for p in plan:
            if p["kind"] == "up":
                x_ref, w_ref, u_ref, b_ref = refs[r:r + 4]
                r += 4
                x = x_ref[...]                          # (n*s_in, c_in) f32
                w = w_ref[...]                          # (c_in, c_out) bf16
                u = u_ref[...]                          # (s_out, s_in) bf16
                s_in = p["s_in"]
                ups = []
                for b_idx in range(n):                  # static unroll (n tiny)
                    xb = x[b_idx * s_in:(b_idx + 1) * s_in, :].astype(jnp.bfloat16)
                    y = jnp.dot(xb, w, preferred_element_type=jnp.float32)
                    y = jnp.dot(u, y.astype(jnp.bfloat16),
                                preferred_element_type=jnp.float32)
                    ups.append(y)
                up = jnp.concatenate(ups, axis=0) if n > 1 else ups[0]
                acc = acc + up + b_ref[...]
            else:                                       # "down": final chain step
                z_ref, w2_ref, b_ref = refs[r:r + 3]
                r += 3
                y = _s2d_conv(z_ref[...], w2_ref[...], n,
                              p["ho"], p["wo"], p["c4"], c_out)
                acc = acc + y + b_ref[...]
        out_ref[...] = jnp.maximum(acc, 0.0).astype(out_ref.dtype)

    return kernel


# ---------------------------------------------------------------------------
# Wrapper-side (plain JAX / numpy) helpers: layout plumbing + parameter prep
# ---------------------------------------------------------------------------
def _space_to_depth(x):
    """(N, H, W, C) -> (N, H/2, W/2, 4C); channel index = (a*2 + b)*C + c with
    a = row parity, b = col parity.  Pure layout, runs in XLA outside kernels."""
    n, h, w, c = x.shape
    assert h % 2 == 0 and w % 2 == 0
    x = x.reshape(n, h // 2, 2, w // 2, 2, c)
    x = x.transpose(0, 1, 3, 2, 4, 5)
    return x.reshape(n, h // 2, w // 2, 4 * c)


def _s2d_weights(w_hwio):
    """Regroup a (3,3,Cin,Cout) stride-2 kernel for the space-to-depth conv.

    Returns (2, 2, 4*Cin, Cout): index [rs, cs] is the matrix applied to the
    s2d input shifted by (rs-1, cs-1); the 4*Cin rows are the four
    (row-parity a, col-parity b) channel blocks.
    """
    _, _, cin, _cout = w_hwio.shape
    # (shift index rs, parity a) -> original kernel row dh (same for columns)
    tap = {(0, 1): 0, (1, 0): 1, (1, 1): 2}
    w2 = np.zeros((2, 2, 4 * cin, _cout), np.float32)
    for (rs, a), dh in tap.items():
        for (cs, b), dw in tap.items():
            blk = (a * 2 + b) * cin
            w2[rs, cs, blk:blk + cin, :] = w_hwio[dh, dw]
    return w2


def _bilinear_matrix(out_size, in_size):
    """PyTorch F.interpolate(mode='bilinear', align_corners=False) as a matrix."""
    u = np.zeros((out_size, in_size), np.float32)
    scale = in_size / out_size
    for o in range(out_size):
        src = max((o + 0.5) * scale - 0.5, 0.0)
        i0 = min(int(np.floor(src)), in_size - 1)
        i1 = min(i0 + 1, in_size - 1)
        frac = src - i0
        u[o, i0] += 1.0 - frac
        u[o, i1] += frac
    return u


def _fold_bn(bn):
    gamma, beta, mean, var = bn
    scale = gamma / jnp.sqrt(var + _BN_EPS)
    bias = beta - mean * scale
    return scale, bias


# ---------------------------------------------------------------------------
# Pallas-backed FuseLayer forward
# ---------------------------------------------------------------------------
def _down_step(x, w2, b):
    """Intermediate downsample-chain step: 3x3 s2 conv + BN + ReLU, one kernel."""
    n, h, w_sp, c = x.shape
    ho, wo = h // 2, w_sp // 2
    cout = w2.shape[-1]
    z = _space_to_depth(x)

    def kernel(z_ref, w2_ref, b_ref, o_ref):
        y = _s2d_conv(z_ref[...], w2_ref[...], n, ho, wo, 4 * c, cout)
        o_ref[...] = jnp.maximum(y + b_ref[...], 0.0).astype(o_ref.dtype)

    out = pl.pallas_call(
        kernel,
        out_shape=jax.ShapeDtypeStruct((n * ho * wo, cout), x.dtype),
        in_specs=[pl.BlockSpec(memory_space=pltpu.MemorySpace.VMEM)
                  for _ in range(3)],
        out_specs=pl.BlockSpec(memory_space=pltpu.MemorySpace.VMEM),
    )(z, w2, b)
    return out.reshape(n, ho, wo, cout)


def fuse_layer_forward(xs, kparams):
    """xs: list of NHWC f32 arrays (one per branch).  Returns list of outputs."""
    outs = []
    for i, row in enumerate(kparams):
        x_i = xs[i]
        n, h_i, w_i, c_i = x_i.shape
        s_i = h_i * w_i
        inputs = [x_i.reshape(n * s_i, c_i)]           # residual, flattened
        plan = []
        for j, path in enumerate(row):
            if path is None:                           # j == i: nn.Identity()
                continue
            if path["kind"] == "up":                   # j > i
                x_j = xs[j]
                _, h_j, w_j, c_j = x_j.shape
                inputs += [x_j.reshape(n * h_j * w_j, c_j),
                           path["wf"], path["U"], path["b"]]
                plan.append(dict(kind="up", s_in=h_j * w_j))
            else:                                      # j < i: downsample chain
                y = xs[j]
                steps = path["steps"]
                for st in steps[:-1]:                  # non-final steps
                    y = _down_step(y, st["w2"], st["b"])
                z = _space_to_depth(y)                 # (n, h_i, w_i, 4*c_prev)
                inputs += [z, steps[-1]["w2"], steps[-1]["b"]]
                plan.append(dict(kind="down", ho=h_i, wo=w_i, c4=z.shape[-1]))

        kernel = _make_fuse_kernel(plan, n, s_i, c_i)
        out = pl.pallas_call(
            kernel,
            out_shape=jax.ShapeDtypeStruct((n * s_i, c_i), x_i.dtype),
            in_specs=[pl.BlockSpec(memory_space=pltpu.MemorySpace.VMEM)
                      for _ in inputs],
            out_specs=pl.BlockSpec(memory_space=pltpu.MemorySpace.VMEM),
        )(*inputs)
        outs.append(out.reshape(n, h_i, w_i, c_i))
    return outs


# ---------------------------------------------------------------------------
# Parameter construction (deterministic, synthetic) and kernel-param prep
# ---------------------------------------------------------------------------
def _rand_bn(key, c):
    k1, k2, k3, k4 = jax.random.split(key, 4)
    return (1.0 + 0.1 * jax.random.normal(k1, (c,), jnp.float32),
            0.1 * jax.random.normal(k2, (c,), jnp.float32),
            0.1 * jax.random.normal(k3, (c,), jnp.float32),
            jax.random.uniform(k4, (c,), jnp.float32, minval=0.5, maxval=1.5))


def make_fuse_params(key, in_channels, out_channels):
    """Synthetic parameters mirroring FuseLayer.__init__ (HWIO conv weights)."""
    params = []
    for i, out_ch in enumerate(out_channels):
        row = []
        for j, in_ch in enumerate(in_channels):
            if j > i:                                   # 1x1 conv + BN, then upsample
                key, kw, kbn = jax.random.split(key, 3)
                w = 0.2 * jax.random.normal(kw, (1, 1, in_ch, out_ch), jnp.float32)
                row.append(dict(kind="up", w=w, bn=_rand_bn(kbn, out_ch)))
            elif j == i:
                row.append(None)                        # nn.Identity()
            else:                                       # downsample chain
                steps, pre = [], in_ch
                for k in range(i - j):
                    last = (k == i - j - 1)
                    cout = out_ch if last else out_channels[j]
                    key, kw, kbn = jax.random.split(key, 3)
                    w = 0.1 * jax.random.normal(kw, (3, 3, pre, cout), jnp.float32)
                    steps.append(dict(w=w, bn=_rand_bn(kbn, cout)))
                    pre = cout
                row.append(dict(kind="down", steps=steps))
        params.append(row)
    return params


def prepare_kernel_params(params, xs, multi_scale_output=True):
    """Fold BN, regroup stride-2 weights, precompute bilinear matrices, bf16-cast."""
    n_out = len(params) if multi_scale_output else 1
    kparams = []
    for i in range(n_out):
        h_i, w_i = xs[i].shape[1:3]
        row = []
        for j, path in enumerate(params[i]):
            if path is None:
                row.append(None)
            elif path["kind"] == "up":
                scale, bias = _fold_bn(path["bn"])
                wf = (path["w"][0, 0] * scale[None, :]).astype(jnp.bfloat16)
                h_j, w_j = xs[j].shape[1:3]
                u = jnp.asarray(np.kron(_bilinear_matrix(h_i, h_j),
                                        _bilinear_matrix(w_i, w_j)),
                                dtype=jnp.bfloat16)
                row.append(dict(kind="up", wf=wf, U=u,
                                b=bias.reshape(1, -1).astype(jnp.float32)))
            else:
                steps = []
                for st in path["steps"]:
                    scale, bias = _fold_bn(st["bn"])
                    wfold = (np.asarray(st["w"])
                             * np.asarray(scale)[None, None, None, :])
                    steps.append(dict(
                        w2=jnp.asarray(_s2d_weights(wfold), dtype=jnp.bfloat16),
                        b=bias.reshape(1, -1).astype(jnp.float32)))
                row.append(dict(kind="down", steps=steps))
        kparams.append(row)
    return kparams


# ---------------------------------------------------------------------------
# Pure-JAX reference (independent of the kernel formulation)
# ---------------------------------------------------------------------------
def _ref_bn(y, bn):
    gamma, beta, mean, var = bn
    return (y - mean) / jnp.sqrt(var + _BN_EPS) * gamma + beta


def _ref_bilinear_resize(x, out_h, out_w):
    """Bilinear resize, PyTorch align_corners=False semantics (NHWC)."""
    _, h, w, _ = x.shape

    def idx(out_size, in_size):
        o = jnp.arange(out_size, dtype=jnp.float32)
        src = jnp.maximum((o + 0.5) * (in_size / out_size) - 0.5, 0.0)
        i0 = jnp.clip(jnp.floor(src).astype(jnp.int32), 0, in_size - 1)
        i1 = jnp.minimum(i0 + 1, in_size - 1)
        return i0, i1, src - i0.astype(jnp.float32)

    h0, h1, fh = idx(out_h, h)
    w0, w1, fw = idx(out_w, w)
    top = (x[:, h0] * (1.0 - fh)[None, :, None, None]
           + x[:, h1] * fh[None, :, None, None])
    return (top[:, :, w0] * (1.0 - fw)[None, None, :, None]
            + top[:, :, w1] * fw[None, None, :, None])


def ref_fuse_layer(xs, params, multi_scale_output=True):
    n_out = len(params) if multi_scale_output else 1
    dn = ("NHWC", "HWIO", "NHWC")
    outs = []
    for i in range(n_out):
        residual = xs[i]
        h_i, w_i = residual.shape[1:3]
        for j in range(len(xs)):
            path = params[i][j]
            if path is None:
                continue
            if path["kind"] == "up":
                y = lax.conv_general_dilated(xs[j], path["w"], (1, 1),
                                             [(0, 0), (0, 0)],
                                             dimension_numbers=dn)
                y = _ref_bn(y, path["bn"])
                residual = residual + _ref_bilinear_resize(y, h_i, w_i)
            else:
                y = xs[j]
                steps = path["steps"]
                for k, st in enumerate(steps):
                    y = lax.conv_general_dilated(y, st["w"], (2, 2),
                                                 [(1, 1), (1, 1)],
                                                 dimension_numbers=dn)
                    y = _ref_bn(y, st["bn"])
                    if k < len(steps) - 1:
                        y = jax.nn.relu(y)
                residual = residual + y
        outs.append(jax.nn.relu(residual))
    return outs


# ---------------------------------------------------------------------------
if __name__ == "__main__":
    key = jax.random.PRNGKey(0)

    # HRNet-style 3-branch config: branch j at resolution 16 / 2^j, channels
    # [8, 16, 32] (in_channels == out_channels, as FuseLayer's residual add
    # requires).  Exercises upsample x2/x4 paths and 1- and 2-step downsample
    # chains with intermediate ReLU.
    in_channels = [8, 16, 32]
    out_channels = [8, 16, 32]
    n, h0, w0 = 2, 16, 16

    k_p, *k_xs = jax.random.split(key, 1 + len(in_channels))
    xs = [jax.random.normal(k_xs[j],
                            (n, h0 // (2 ** j), w0 // (2 ** j), in_channels[j]),
                            jnp.float32)
          for j in range(len(in_channels))]

    params = make_fuse_params(k_p, in_channels, out_channels)
    kparams = prepare_kernel_params(params, xs, multi_scale_output=True)

    outs = fuse_layer_forward(xs, kparams)
    outs = [jax.block_until_ready(o) for o in outs]

    refs = ref_fuse_layer(xs, params, multi_scale_output=True)
    for i, (o, r) in enumerate(zip(outs, refs)):
        assert o.shape == r.shape and o.dtype == r.dtype, (o.shape, r.shape)
        max_diff = float(jnp.max(jnp.abs(o - r)))
        assert jnp.allclose(o, r, atol=5e-2, rtol=5e-2), (
            f"branch {i}: max abs diff {max_diff}")

    print("KERNEL_OK")
</pallas_src>

<mosaic_0001>
module attributes {stable_mosaic.version = 11 : i64} {
  func.func @kernel(%arg0: memref<512x8xf32, #tpu.memory_space<vmem>>, %arg1: memref<128x16xf32, #tpu.memory_space<vmem>>, %arg2: memref<16x8xbf16, #tpu.memory_space<vmem>>, %arg3: memref<256x64xbf16, #tpu.memory_space<vmem>>, %arg4: memref<1x8xf32, #tpu.memory_space<vmem>>, %arg5: memref<32x32xf32, #tpu.memory_space<vmem>>, %arg6: memref<32x8xbf16, #tpu.memory_space<vmem>>, %arg7: memref<256x16xbf16, #tpu.memory_space<vmem>>, %arg8: memref<1x8xf32, #tpu.memory_space<vmem>>, %arg9: memref<512x8xf32, #tpu.memory_space<vmem>>) attributes {dimension_semantics = [], scalar_prefetch = 0 : i64, scratch_operands = 0 : i64, tpu.core_type = #tpu.core_type<tc>} {
    %c0 = arith.constant 0 : index
    %c0_0 = arith.constant 0 : index
    %0 = vector.load %arg0[%c0, %c0_0] : memref<512x8xf32, #tpu.memory_space<vmem>>, vector<512x8xf32>
    %c0_1 = arith.constant 0 : index
    %c0_2 = arith.constant 0 : index
    %1 = vector.load %arg1[%c0_1, %c0_2] : memref<128x16xf32, #tpu.memory_space<vmem>>, vector<128x16xf32>
    %c0_3 = arith.constant 0 : index
    %c0_4 = arith.constant 0 : index
    %2 = vector.load %arg2[%c0_3, %c0_4] : memref<16x8xbf16, #tpu.memory_space<vmem>>, vector<16x8xbf16>
    %c0_5 = arith.constant 0 : index
    %c0_6 = arith.constant 0 : index
    %3 = vector.load %arg3[%c0_5, %c0_6] : memref<256x64xbf16, #tpu.memory_space<vmem>>, vector<256x64xbf16>
    %4 = vector.extract_strided_slice %1 {offsets = [0, 0], sizes = [64, 16], strides = [1, 1]} : vector<128x16xf32> to vector<64x16xf32>
    %5 = arith.truncf %4 : vector<64x16xf32> to vector<64x16xbf16>
    %cst = arith.constant dense<0.000000e+00> : vector<64x8xf32>
    %6 = tpu.matmul %5, %2, %cst {dimension_numbers = #tpu.dot_dimension_numbers<[1], [0], [0], [1], [0, 0, 1, 1], [], []>} : vector<64x16xbf16>, vector<16x8xbf16>, vector<64x8xf32> -> vector<64x8xf32>
    %7 = arith.truncf %6 : vector<64x8xf32> to vector<64x8xbf16>
    %cst_7 = arith.constant dense<0.000000e+00> : vector<256x8xf32>
    %8 = tpu.matmul %3, %7, %cst_7 {dimension_numbers = #tpu.dot_dimension_numbers<[1], [0], [0], [1], [0, 0, 1, 1], [], []>} : vector<256x64xbf16>, vector<64x8xbf16>, vector<256x8xf32> -> vector<256x8xf32>
    %9 = vector.extract_strided_slice %1 {offsets = [64, 0], sizes = [64, 16], strides = [1, 1]} : vector<128x16xf32> to vector<64x16xf32>
    %10 = arith.truncf %9 : vector<64x16xf32> to vector<64x16xbf16>
    %cst_8 = arith.constant dense<0.000000e+00> : vector<64x8xf32>
    %11 = tpu.matmul %10, %2, %cst_8 {dimension_numbers = #tpu.dot_dimension_numbers<[1], [0], [0], [1], [0, 0, 1, 1], [], []>} : vector<64x16xbf16>, vector<16x8xbf16>, vector<64x8xf32> -> vector<64x8xf32>
    %12 = arith.truncf %11 : vector<64x8xf32> to vector<64x8xbf16>
    %cst_9 = arith.constant dense<0.000000e+00> : vector<256x8xf32>
    %13 = tpu.matmul %3, %12, %cst_9 {dimension_numbers = #tpu.dot_dimension_numbers<[1], [0], [0], [1], [0, 0, 1, 1], [], []>} : vector<256x64xbf16>, vector<64x8xbf16>, vector<256x8xf32> -> vector<256x8xf32>
    %14 = tpu.concatenate %8, %13 in 0 : vector<256x8xf32>, vector<256x8xf32> -> vector<512x8xf32>
    %15 = arith.addf %0, %14 : vector<512x8xf32>
    %c0_10 = arith.constant 0 : index
    %c0_11 = arith.constant 0 : index
    %16 = vector.load %arg4[%c0_10, %c0_11] : memref<1x8xf32, #tpu.memory_space<vmem>>, vector<1x8xf32>
    %17 = vector.broadcast %16 : vector<1x8xf32> to vector<512x8xf32>
    %18 = arith.addf %15, %17 : vector<512x8xf32>
    %c0_12 = arith.constant 0 : index
    %c0_13 = arith.constant 0 : index
    %19 = vector.load %arg5[%c0_12, %c0_13] : memref<32x32xf32, #tpu.memory_space<vmem>>, vector<32x32xf32>
    %c0_14 = arith.constant 0 : index
    %c0_15 = arith.constant 0 : index
    %20 = vector.load %arg6[%c0_14, %c0_15] : memref<32x8xbf16, #tpu.memory_space<vmem>>, vector<32x8xbf16>
    %c0_16 = arith.constant 0 : index
    %c0_17 = arith.constant 0 : index
    %21 = vector.load %arg7[%c0_16, %c0_17] : memref<256x16xbf16, #tpu.memory_space<vmem>>, vector<256x16xbf16>
    %22 = vector.extract_strided_slice %19 {offsets = [0, 0], sizes = [16, 32], strides = [1, 1]} : vector<32x32xf32> to vector<16x32xf32>
    %23 = arith.truncf %22 : vector<16x32xf32> to vector<16x32xbf16>
    %cst_18 = arith.constant dense<0.000000e+00> : vector<16x8xf32>
    %24 = tpu.matmul %23, %20, %cst_18 {dimension_numbers = #tpu.dot_dimension_numbers<[1], [0], [0], [1], [0, 0, 1, 1], [], []>} : vector<16x32xbf16>, vector<32x8xbf16>, vector<16x8xf32> -> vector<16x8xf32>
    %25 = arith.truncf %24 : vector<16x8xf32> to vector<16x8xbf16>
    %cst_19 = arith.constant dense<0.000000e+00> : vector<256x8xf32>
    %26 = tpu.matmul %21, %25, %cst_19 {dimension_numbers = #tpu.dot_dimension_numbers<[1], [0], [0], [1], [0, 0, 1, 1], [], []>} : vector<256x16xbf16>, vector<16x8xbf16>, vector<256x8xf32> -> vector<256x8xf32>
    %27 = vector.extract_strided_slice %19 {offsets = [16, 0], sizes = [16, 32], strides = [1, 1]} : vector<32x32xf32> to vector<16x32xf32>
    %28 = arith.truncf %27 : vector<16x32xf32> to vector<16x32xbf16>
    %cst_20 = arith.constant dense<0.000000e+00> : vector<16x8xf32>
    %29 = tpu.matmul %28, %20, %cst_20 {dimension_numbers = #tpu.dot_dimension_numbers<[1], [0], [0], [1], [0, 0, 1, 1], [], []>} : vector<16x32xbf16>, vector<32x8xbf16>, vector<16x8xf32> -> vector<16x8xf32>
    %30 = arith.truncf %29 : vector<16x8xf32> to vector<16x8xbf16>
    %cst_21 = arith.constant dense<0.000000e+00> : vector<256x8xf32>
    %31 = tpu.matmul %21, %30, %cst_21 {dimension_numbers = #tpu.dot_dimension_numbers<[1], [0], [0], [1], [0, 0, 1, 1], [], []>} : vector<256x16xbf16>, vector<16x8xbf16>, vector<256x8xf32> -> vector<256x8xf32>
    %32 = tpu.concatenate %26, %31 in 0 : vector<256x8xf32>, vector<256x8xf32> -> vector<512x8xf32>
    %33 = arith.addf %18, %32 : vector<512x8xf32>
    %c0_22 = arith.constant 0 : index
    %c0_23 = arith.constant 0 : index
    %34 = vector.load %arg8[%c0_22, %c0_23] : memref<1x8xf32, #tpu.memory_space<vmem>>, vector<1x8xf32>
    %35 = vector.broadcast %34 : vector<1x8xf32> to vector<512x8xf32>
    %36 = arith.addf %33, %35 : vector<512x8xf32>
    %cst_24 = arith.constant 0.000000e+00 : f32
    %37 = vector.broadcast %cst_24 : f32 to vector<512x8xf32>
    %38 = arith.maximumf %36, %37 : vector<512x8xf32>
    %c0_25 = arith.constant 0 : index
    %c0_26 = arith.constant 0 : index
    %39 = vector.load %arg9[%c0_25, %c0_26] : memref<512x8xf32, #tpu.memory_space<vmem>>, vector<512x8xf32>
    tpu.vector_store %arg9[%c0_25, %c0_26], %38 {strides = array<i32>} : memref<512x8xf32, #tpu.memory_space<vmem>>, vector<512x8xf32>,
    return
  }
}

</mosaic_0001>

<bundles_post_ra>
// kernel: tpu_custom_call.1
= control target key start
LH: loop header
LB: loop body
LE: loop exit
PB: predicated region body
PF: predicated region fallthrough
CT: control target
= control target key end

     0   :  { %vm157_vm0 = vcmask 130048   ;;  %vm319_vm1 = vcmask 523264   ;;  %v2387_v52 = vmov 0.0   ;;  %vm2388_vm2 = vmmov 0   ;;  %s3262_s2 = inlined_call_operand.vmem [shape: bf16[16,8], index: 2, kind: input, shape index: {}]   ;;  %s3263_s1 = inlined_call_operand.vmem [shape: f32[128,16], index: 1, kind: input, shape index: {}]   ;;  %s3264_s3 = inlined_call_operand.vmem [shape: bf16[256,64], index: 3, kind: input, shape index: {}]   ;;  %s3265_s6 = inlined_call_operand.vmem [shape: bf16[32,8], index: 6, kind: input, shape index: {}]   ;;  %s3266_s5 = inlined_call_operand.vmem [shape: f32[32,32], index: 5, kind: input, shape index: {}]   ;;  %s3267_s7 = inlined_call_operand.vmem [shape: bf16[256,16], index: 7, kind: input, shape index: {}]   ;;  %s3268_s0 = inlined_call_operand.vmem [shape: f32[512,8], index: 0, kind: input, shape index: {}]   ;;  %s3269_s4 = inlined_call_operand.vmem [shape: f32[1,8], index: 4, kind: input, shape index: {}]   ;;  %s3270_s8 = inlined_call_operand.vmem [shape: f32[1,8], index: 8, kind: input, shape index: {}]   ;;  %s3271_s9 = inlined_call_operand.vmem [shape: f32[512,8], index: 9, kind: output, shape index: {}]  }
   0x1   :  { %v2352_v0 = vld [vmem:[%s3262_s2] sm:$0xff]   ;;  %v98_v2 = vld [vmem:[%s3263_s1 + $0x8] sm:$0xff]  ;;  %v99_v6 = vld [vmem:[%s3263_s1 + $0x10] sm:$0xff]  ;;  %vm963_vm3 = vcmask 261120   ;;  %vm1704_vm4 = vcmask 64512  }
   0x2   :  { %v97_v1 = vld [vmem:[%s3263_s1] sm:$0xff]  ;;  %1974 = vmatprep.subr.bf16.mxu1 %v2352_v0  ;;  %2024 = vmatprep.subr.bf16.mxu0 %v2352_v0  ;;  %v106_v5 = vld [vmem:[%s3263_s1 + $0x48] sm:$0xff]  ;;  %v100_v7 = vld [vmem:[%s3263_s1 + $0x18] sm:$0xff] }
   0x3   :  { %v105_v3 = vld [vmem:[%s3263_s1 + $0x40] sm:$0xff]  ;;  %v147_v4 = vpack.c.bf16 %v98_v2, %v97_v1  ;;  %1975 = vmatpush3.bf16.msra.mxu1 %v2352_v0  ;;  %2025 = vmatpush3.bf16.msra.mxu0 %v2352_v0  ;;  %v148_v9 = vpack.c.bf16 %v100_v7, %v99_v6  ;;  %v107_v10 = vld [vmem:[%s3263_s1 + $0x50] sm:$0xff]  ;;  %v108_v11 = vld [vmem:[%s3263_s1 + $0x58] sm:$0xff] }
   0x4   :  { %v529_v8 = vpack.c.bf16 %v106_v5, %v105_v3  ;;  %v101_v12 = vld [vmem:[%s3263_s1 + $0x20] sm:$0xff]  ;;  %v530_v13 = vpack.c.bf16 %v108_v11, %v107_v10  ;;  %v102_v14 = vld [vmem:[%s3263_s1 + $0x28] sm:$0xff]  ;;  %v103_v19 = vld [vmem:[%s3263_s1 + $0x30] sm:$0xff] }
   0x5   :  { %1976 = vmatprep.mubr.msk.bf16.mxu1 %vm157_vm0, %v147_v4  ;;  %v109_v15 = vld [vmem:[%s3263_s1 + $0x60] sm:$0xff]  ;;  %v110_v16 = vld [vmem:[%s3263_s1 + $0x68] sm:$0xff]  ;;  %v149_v17 = vpack.c.bf16 %v102_v14, %v101_v12  ;;  %v104_v20 = vld [vmem:[%s3263_s1 + $0x38] sm:$0xff] }
   0x6   :  { %2026 = vmatprep.mubr.msk.bf16.mxu0 %vm157_vm0, %v529_v8  ;;  %v531_v18 = vpack.c.bf16 %v110_v16, %v109_v15  ;;  %1977 = vmatmul.mubr.msk.bf16.vlgmr.msra.gmra.mrb[0].mxu1 %vm157_vm0, %v148_v9  ;;  %v111_v21 = vld [vmem:[%s3263_s1 + $0x70] sm:$0xff]  ;;  %v112_v22 = vld [vmem:[%s3263_s1 + $0x78] sm:$0xff]  ;;  %v150_v23 = vpack.c.bf16 %v104_v20, %v103_v19  ;;  %v2353_v25 = vld [vmem:[%s3264_s3] sm:$0xff]  }
   0x7   :  { %2027 = vmatmul.mubr.msk.bf16.vlgmr.msra.gmra.mrb[0].mxu0 %vm157_vm0, %v530_v13  ;;  %1980 = vmatprep.mubr.msk.bf16.mxu1 %vm157_vm0, %v149_v17  ;;  %v532_v24 = vpack.c.bf16 %v112_v22, %v111_v21  ;;  %v2354_v50 = vld [vmem:[%s3264_s3 + $0x8] sm:$0xff]   ;;  %v2355_v51 = vld [vmem:[%s3265_s6] sm:$0xff]   ;;  %v2356_v53 = vld [vmem:[%s3264_s3 + $0x10] sm:$0xff]  }
   0x8   :  { %2030 = vmatprep.mubr.msk.bf16.mxu0 %vm157_vm0, %v531_v18  ;;  %v2364_v54 = vld [vmem:[%s3265_s6 + $0x8] sm:$0xff]   ;;  %v2357_v55 = vld [vmem:[%s3264_s3 + $0x18] sm:$0xff]   ;;  %v2358_v56 = vld [vmem:[%s3264_s3 + $0x20] sm:$0xff]  }
   0x9   :  { %v2359_v57 = vld [vmem:[%s3264_s3 + $0x28] sm:$0xff]   ;;  %v2360_v58 = vld [vmem:[%s3264_s3 + $0x30] sm:$0xff]   ;;  %v2361_v59 = vld [vmem:[%s3264_s3 + $0x38] sm:$0xff]  }
   0xa   :  { %v2362_v60 = vld [vmem:[%s3264_s3 + $0x40] sm:$0xff]   ;;  %v2363_v61 = vld [vmem:[%s3264_s3 + $0x48] sm:$0xff]   ;;  %v2365_v62 = vld [vmem:[%s3264_s3 + $0x50] sm:$0xff]  }
   0xb   :  { %v2366_v63 = vld [vmem:[%s3264_s3 + $0x58] sm:$0xff]   ;;  %v2367_v0 = vld [vmem:[%s3264_s3 + $0x60] sm:$0xff]   ;;  %v2368_v1 = vld [vmem:[%s3264_s3 + $0x68] sm:$0xff]  }
   0xc   :  { %v2369_v2 = vld [vmem:[%s3264_s3 + $0x70] sm:$0xff]   ;;  %v2370_v3 = vld [vmem:[%s3264_s3 + $0x78] sm:$0xff]   ;;  %v910_v4 = vld [vmem:[%s3266_s5] sm:$0xff] }
   0xd   :  { %v911_v5 = vld [vmem:[%s3266_s5 + $0x8] sm:$0xff]  ;;  %v912_v6 = vld [vmem:[%s3266_s5 + $0x10] sm:$0xff]  ;;  %v913_v7 = vld [vmem:[%s3266_s5 + $0x18] sm:$0xff] }
   0xe   :  { %1981 = vmatmul.mubr.msk.bf16.gmra.mrb[4].mxu1 %vm157_vm0, %v150_v23  ;;  %v950_v8 = vpack.c.bf16 %v911_v5, %v910_v4  ;;  %v1298_v9 = vpack.c.bf16 %v913_v7, %v912_v6  ;;  %v2371_v10 = vld [vmem:[%s3267_s7] sm:$0xff]   ;;  %v2372_v21 = vld [vmem:[%s3267_s7 + $0x8] sm:$0xff]   ;;  %v2373_v22 = vld [vmem:[%s3267_s7 + $0x10] sm:$0xff]  }
   0xf   :  { %2031 = vmatmul.mubr.msk.bf16.gmra.mrb[4].mxu0 %vm157_vm0, %v532_v24  ;;  %1992 = vmatprep.mubr.msk.bf16.mxu1 %vm319_vm1, %v2353_v25  ;;  %v2374_v23 = vld [vmem:[%s3267_s7 + $0x18] sm:$0xff]   ;;  %v2375_v24 = vld [vmem:[%s3267_s7 + $0x20] sm:$0xff]  }
  0x10   :  { %2042 = vmatprep.mubr.msk.bf16.mxu0 %vm319_vm1, %v2353_v25  ;;  %v2376_v25 = vld [vmem:[%s3267_s7 + $0x28] sm:$0xff]  }
  0xd9   :  { %v1978_v26 = vpop.f32.mrb[0].mxu1 }
  0xda   :  { %v2028_v27 = vpop.f32.mrb[0].mxu0  ;;  %v204_v28 = vpop.f32.mrb[1].mxu1 }
  0xdb   :  { %v579_v29 = vpop.f32.mrb[1].mxu0  ;;  %v1979_v30 = vpop.f32.mrb[2].mxu1 }
  0xdc   :  { %v2029_v31 = vpop.f32.mrb[2].mxu0  ;;  %v236_v32 = vpack.c.bf16 %v1979_v30, %v1978_v26  ;;  %v207_v34 = vpop.f32.mrb[3].mxu1  ;;  %v2377_v26 = vld [vmem:[%s3267_s7 + $0x30] sm:$0xff]  }
  0xdd   :  { %v611_v33 = vpack.c.bf16 %v2029_v31, %v2028_v27  ;;  %v582_v35 = vpop.f32.mrb[3].mxu0  ;;  %v235_v36 = vpack.c.bf16 %v207_v34, %v204_v28  ;;  %v2378_v27 = vld [vmem:[%s3267_s7 + $0x38] sm:$0xff]   ;;  %v2379_v28 = vld [vmem:[%s3267_s7 + $0x40] sm:$0xff]   ;;  %v2381_v30 = vld [vmem:[%s3267_s7 + $0x50] sm:$0xff]  }
  0xde   :  { %v610_v37 = vpack.c.bf16 %v582_v35, %v579_v29  ;;  %v2380_v29 = vld [vmem:[%s3267_s7 + $0x48] sm:$0xff]   ;;  %v2382_v31 = vld [vmem:[%s3267_s7 + $0x58] sm:$0xff]   ;;  %v2385_v34 = vld [vmem:[%s3267_s7 + $0x70] sm:$0xff]  }
  0xdf   :  { %1984 = vmatprep.subr.bf16.mxu1 %v235_v36  ;;  %v2386_v35 = vld [vmem:[%s3267_s7 + $0x78] sm:$0xff]  }
  0xe0   :  { %2034 = vmatprep.subr.bf16.mxu0 %v610_v37  ;;  %1985 = vmatpush3.bf16.msra.mxu1 %v235_v36  ;;  %v35_v36 = vld [vmem:[%s3268_s0 + $0x10] sm:$0xff] }
  0xe1   :  { %2035 = vmatpush3.bf16.msra.mxu0 %v610_v37  ;;  %v1982_v38 = vpop.f32.mrb[4].mxu1  ;;  %1986 = vmatprep.subr.bf16.mxu1 %v236_v32  ;;  %v2682_v37 = vld [vmem:[%s3269_s4] ss:$0 sm:$0xff] }
  0xe2   :  { %v2032_v39 = vpop.f32.mrb[4].mxu0  ;;  %2036 = vmatprep.subr.bf16.mxu0 %v611_v33  ;;  %v220_v40 = vpop.f32.mrb[5].mxu1 }
  0xe3   :  { %v595_v41 = vpop.f32.mrb[5].mxu0  ;;  %v1983_v42 = vpop.f32.mrb[6].mxu1 }
  0xe4   :  { %v2033_v43 = vpop.f32.mrb[6].mxu0  ;;  %v238_v44 = vpack.c.bf16 %v1983_v42, %v1982_v38  ;;  %v223_v46 = vpop.f32.mrb[7].mxu1  ;;  %1987 = vmatpush3.bf16.msra.mxu1 %v236_v32  ;;  %v2383_v32 = vld [vmem:[%s3267_s7 + $0x60] sm:$0xff]   ;;  %v67_v38 = vld [vmem:[%s3268_s0 + $0x110] sm:$0xff]  ;;  %v68_v42 = vld [vmem:[%s3268_s0 + $0x118] sm:$0xff] }
  0xe5   :  { %v613_v45 = vpack.c.bf16 %v2033_v43, %v2032_v39  ;;  %v598_v47 = vpop.f32.mrb[7].mxu0  ;;  %2037 = vmatpush3.bf16.msra.mxu0 %v611_v33  ;;  %v237_v48 = vpack.c.bf16 %v223_v46, %v220_v40  ;;  %v2384_v33 = vld [vmem:[%s3267_s7 + $0x68] sm:$0xff]   ;;  %v33_v39 = vld [vmem:[%s3268_s0] sm:$0xff]  ;;  %v2158_v43 = vadd.f32 %v2682_v37, %v35_v36 }
  0xe6   :  { %v612_v49 = vpack.c.bf16 %v598_v47, %v595_v41  ;;  %v65_v40 = vld [vmem:[%s3268_s0 + $0x100] sm:$0xff]  ;;  %v36_v41 = vld [vmem:[%s3268_s0 + $0x18] sm:$0xff]  ;;  %v66_v46 = vld [vmem:[%s3268_s0 + $0x108] sm:$0xff]  ;;  %v2160_v47 = vadd.f32 %v2682_v37, %v33_v39 }
  0xe7   :  { %1988 = vmatprep.subr.bf16.mxu1 %v237_v48  ;;  %v41_v36 = vld [vmem:[%s3268_s0 + $0x40] sm:$0xff] }
  0xe8   :  { %2038 = vmatprep.subr.bf16.mxu0 %v612_v49  ;;  %1989 = vmatpush3.bf16.msra.mxu1 %v237_v48  ;;  %v2224_v48 = vadd.f32 %v2682_v37, %v65_v40 }
  0xe9   :  { %2039 = vmatpush3.bf16.msra.mxu0 %v612_v49  ;;  %1990 = vmatprep.subr.bf16.mxu1 %v238_v44  ;;  %v39_v49 = vld [vmem:[%s3268_s0 + $0x30] sm:$0xff] }
  0xea   :  { %2040 = vmatprep.subr.bf16.mxu0 %v613_v45 }
  0xec   :  { %1991 = vmatpush3.bf16.msra.mxu1 %v238_v44  ;;  %v2222_v44 = vadd.f32 %v2682_v37, %v67_v38  ;;  %v73_v38 = vld [vmem:[%s3268_s0 + $0x140] sm:$0xff] }
  0xed   :  { %2041 = vmatpush3.bf16.msra.mxu0 %v613_v45  ;;  %2074 = vmatprep.subr.bf16.mxu1 %v2387_v52  ;;  %v34_v45 = vld [vmem:[%s3268_s0 + $0x8] sm:$0xff] }
  0xee   :  { %2116 = vmatprep.subr.bf16.mxu0 %v2387_v52 }
  0xef   :  { %1993 = vmatmul.mubr.msk.bf16.vlgmr.msra.gmra.mrb[8].mxu1 %vm319_vm1, %v2354_v50 }
  0xf0   :  { %2043 = vmatmul.mubr.msk.bf16.vlgmr.msra.gmra.mrb[8].mxu0 %vm319_vm1, %v2354_v50  ;;  %2075 = vmatpush3.bf16.msra.mxu1 %v2355_v51  ;;  %v71_v50 = vld [vmem:[%s3268_s0 + $0x130] sm:$0xff] }
  0xf1   :  { %2117 = vmatpush3.bf16.msra.mxu0 %v2355_v51  ;;  %1996 = vmatprep.mubr.msk.bf16.mxu1 %vm319_vm1, %v2356_v53  ;;  %v2162_v51 = vadd.f32 %v2682_v37, %v36_v41 }
  0xf2   :  { %2046 = vmatprep.mubr.msk.bf16.mxu0 %vm319_vm1, %v2356_v53  ;;  %2076 = vmatprep.subr.bf16.mxu1 %v2387_v52  ;;  %v37_v53 = vld [vmem:[%s3268_s0 + $0x20] sm:$0xff] }
  0xf3   :  { %2118 = vmatprep.subr.bf16.mxu0 %v2387_v52  ;;  %v2168_v6 = vadd.f32 %v2682_v37, %v37_v53 }
  0xf4   :  { %2077 = vmatpush3.bf16.msra.mxu1 %v2364_v54 }
  0xf5   :  { %2119 = vmatpush3.bf16.msra.mxu0 %v2364_v54  ;;  %v69_v54 = vld [vmem:[%s3268_s0 + $0x120] sm:$0xff] }
  0xf6   :  { %v2232_v7 = vadd.f32 %v2682_v37, %v69_v54 }
  0xf7   :  { %1997 = vmatmul.mubr.msk.bf16.gmra.mrb[12].mxu1 %vm319_vm1, %v2357_v55 }
  0xf8   :  { %2047 = vmatmul.mubr.msk.bf16.gmra.mrb[12].mxu0 %vm319_vm1, %v2357_v55  ;;  %2000 = vmatprep.mubr.msk.bf16.mxu1 %vm319_vm1, %v2358_v56 }
  0xf9   :  { %2050 = vmatprep.mubr.msk.bf16.mxu0 %vm319_vm1, %v2358_v56  ;;  %v2726_v56 = vld [vmem:[%s3270_s8] ss:$0 sm:$0xff] }
  0xff   :  { %2001 = vmatmul.mubr.msk.bf16.gmra.mrb[16].mxu1 %vm319_vm1, %v2359_v57 }
 0x100   :  { %2051 = vmatmul.mubr.msk.bf16.gmra.mrb[16].mxu0 %vm319_vm1, %v2359_v57  ;;  %2004 = vmatprep.mubr.msk.bf16.mxu1 %vm319_vm1, %v2360_v58 }
 0x101   :  { %2054 = vmatprep.mubr.msk.bf16.mxu0 %vm319_vm1, %v2360_v58  ;;  %v2164_v58 = vadd.f32 %v2682_v37, %v34_v45 }
 0x107   :  { %2005 = vmatmul.mubr.msk.bf16.gmra.mrb[20].mxu1 %vm319_vm1, %v2361_v59 }
 0x108   :  { %2055 = vmatmul.mubr.msk.bf16.gmra.mrb[20].mxu0 %vm319_vm1, %v2361_v59  ;;  %2008 = vmatprep.mubr.msk.bf16.mxu1 %vm319_vm1, %v2362_v60  ;;  %v2228_v59 = vadd.f32 %v2682_v37, %v66_v46 }
 0x109   :  { %2058 = vmatprep.mubr.msk.bf16.mxu0 %vm319_vm1, %v2362_v60 }
 0x10f   :  { %2009 = vmatmul.mubr.msk.bf16.gmra.mrb[24].mxu1 %vm319_vm1, %v2363_v61 }
 0x110   :  { %2059 = vmatmul.mubr.msk.bf16.gmra.mrb[24].mxu0 %vm319_vm1, %v2363_v61  ;;  %2012 = vmatprep.mubr.msk.bf16.mxu1 %vm319_vm1, %v2365_v62 }
 0x111   :  { %2062 = vmatprep.mubr.msk.bf16.mxu0 %vm319_vm1, %v2365_v62 }
 0x117   :  { %2013 = vmatmul.mubr.msk.bf16.gmra.mrb[28].mxu1 %vm319_vm1, %v2366_v63 }
 0x118   :  { %2063 = vmatmul.mubr.msk.bf16.gmra.mrb[28].mxu0 %vm319_vm1, %v2366_v63  ;;  %2016 = vmatprep.mubr.msk.bf16.mxu1 %vm319_vm1, %v2367_v0 }
 0x119   :  { %2066 = vmatprep.mubr.msk.bf16.mxu0 %vm319_vm1, %v2367_v0  ;;  %v2166_v0 = vadd.f32 %v2682_v37, %v39_v49 }
 0x11f   :  { %2017 = vmatmul.mubr.msk.bf16.gmra.mrb[32].mxu1 %vm319_vm1, %v2368_v1 }
 0x120   :  { %2067 = vmatmul.mubr.msk.bf16.gmra.mrb[32].mxu0 %vm319_vm1, %v2368_v1  ;;  %2020 = vmatprep.mubr.msk.bf16.mxu1 %vm319_vm1, %v2369_v2  ;;  %v2230_v1 = vadd.f32 %v2682_v37, %v71_v50 }
 0x121   :  { %2070 = vmatprep.mubr.msk.bf16.mxu0 %vm319_vm1, %v2369_v2 }
 0x127   :  { %2021 = vmatmul.mubr.msk.bf16.gmra.mrb[36].mxu1 %vm319_vm1, %v2370_v3 }
 0x128   :  { %2071 = vmatmul.mubr.msk.bf16.gmra.mrb[36].mxu0 %vm319_vm1, %v2370_v3  ;;  %2078 = vmatprep.mubr.msk.bf16.mxu1 %vm2388_vm2, %v2387_v52 }
 0x129   :  { %2120 = vmatprep.mubr.msk.bf16.mxu0 %vm2388_vm2, %v2387_v52  ;;  %v2226_v52 = vadd.f32 %v2682_v37, %v68_v42 }
 0x12f   :  { %2079 = vmatmul.mubr.msk.bf16.vlgmr.msra.gmra.mrb[40].mxu1 %vm963_vm3, %v950_v8 }
 0x130   :  { %2121 = vmatmul.mubr.msk.bf16.vlgmr.msra.gmra.mrb[40].mxu0 %vm963_vm3, %v1298_v9  ;;  %2084 = vmatprep.mubr.msk.bf16.mxu1 %vm157_vm0, %v2371_v10 }
 0x131   :  { %2126 = vmatprep.mubr.msk.bf16.mxu0 %vm157_vm0, %v2371_v10 }
 0x202   :  { %v1001_v11 = vpop.f32.mrb[40].mxu1 }
 0x203   :  { %v1336_v12 = vpop.f32.mrb[40].mxu0  ;;  %v2080_v13 = vpop.f32.mrb[41].mxu1 }
 0x204   :  { %v2122_v14 = vpop.f32.mrb[41].mxu0  ;;  %v1004_v15 = vpop.f32.mrb[42].mxu1 }
 0x205   :  { %v1339_v16 = vpop.f32.mrb[42].mxu0  ;;  %v1008_v17 = vpack.c.bf16 %v1004_v15, %v1001_v11  ;;  %v2081_v19 = vpop.f32.mrb[43].mxu1 }
 0x206   :  { %v1343_v18 = vpack.c.bf16 %v1339_v16, %v1336_v12  ;;  %v2123_v20 = vpop.f32.mrb[43].mxu0  ;;  %v72_v19 = vld [vmem:[%s3268_s0 + $0x138] sm:$0xff] }
 0x207   :  { %2082 = vmatprep.subr.bf16.mxu1 %v1008_v17 }
 0x208   :  { %2124 = vmatprep.subr.bf16.mxu0 %v1343_v18  ;;  %2083 = vmatpush3.bf16.msra.mxu1 %v1008_v17 }
 0x209   :  { %2125 = vmatpush3.bf16.msra.mxu0 %v1343_v18  ;;  %v40_v18 = vld [vmem:[%s3268_s0 + $0x38] sm:$0xff] }
 0x20b   :  { %2085 = vmatmul.mubr.msk.bf16.vlgmr.msra.gmra.mrb[8].mxu1 %vm157_vm0, %v2372_v21 }
 0x20c   :  { %2127 = vmatmul.mubr.msk.bf16.vlgmr.msra.gmra.mrb[8].mxu0 %vm157_vm0, %v2372_v21  ;;  %2088 = vmatprep.mubr.msk.bf16.mxu1 %vm157_vm0, %v2373_v22 }
 0x20d   :  { %2130 = vmatprep.mubr.msk.bf16.mxu0 %vm157_vm0, %v2373_v22 }
 0x213   :  { %2089 = vmatmul.mubr.msk.bf16.gmra.mrb[12].mxu1 %vm157_vm0, %v2374_v23 }
 0x214   :  { %2131 = vmatmul.mubr.msk.bf16.gmra.mrb[12].mxu0 %vm157_vm0, %v2374_v23  ;;  %2092 = vmatprep.mubr.msk.bf16.mxu1 %vm157_vm0, %v2375_v24 }
 0x215   :  { %2134 = vmatprep.mubr.msk.bf16.mxu0 %vm157_vm0, %v2375_v24  ;;  %v38_v24 = vld [vmem:[%s3268_s0 + $0x28] sm:$0xff] }
 0x21b   :  { %2093 = vmatmul.mubr.msk.bf16.gmra.mrb[16].mxu1 %vm157_vm0, %v2376_v25 }
 0x21c   :  { %2135 = vmatmul.mubr.msk.bf16.gmra.mrb[16].mxu0 %vm157_vm0, %v2376_v25  ;;  %2096 = vmatprep.mubr.msk.bf16.mxu1 %vm157_vm0, %v2377_v26  ;;  %v70_v25 = vld [vmem:[%s3268_s0 + $0x128] sm:$0xff] }
 0x21d   :  { %2138 = vmatprep.mubr.msk.bf16.mxu0 %vm157_vm0, %v2377_v26 }
 0x223   :  { %2097 = vmatmul.mubr.msk.bf16.gmra.mrb[20].mxu1 %vm157_vm0, %v2378_v27 }
 0x224   :  { %2139 = vmatmul.mubr.msk.bf16.gmra.mrb[20].mxu0 %vm157_vm0, %v2378_v27  ;;  %2100 = vmatprep.mubr.msk.bf16.mxu1 %vm157_vm0, %v2379_v28 }
 0x225   :  { %2142 = vmatprep.mubr.msk.bf16.mxu0 %vm157_vm0, %v2379_v28 }
 0x22b   :  { %2101 = vmatmul.mubr.msk.bf16.gmra.mrb[24].mxu1 %vm157_vm0, %v2380_v29 }
 0x22c   :  { %2143 = vmatmul.mubr.msk.bf16.gmra.mrb[24].mxu0 %vm157_vm0, %v2380_v29  ;;  %2104 = vmatprep.mubr.msk.bf16.mxu1 %vm157_vm0, %v2381_v30 }
 0x22d   :  { %2146 = vmatprep.mubr.msk.bf16.mxu0 %vm157_vm0, %v2381_v30  ;;  %v43_v30 = vld [vmem:[%s3268_s0 + $0x50] sm:$0xff] }
 0x22e   :  { %v2174_v49 = vadd.f32 %v2682_v37, %v43_v30 }
 0x233   :  { %2105 = vmatmul.mubr.msk.bf16.gmra.mrb[28].mxu1 %vm157_vm0, %v2382_v31 }
 0x234   :  { %2147 = vmatmul.mubr.msk.bf16.gmra.mrb[28].mxu0 %vm157_vm0, %v2382_v31  ;;  %2108 = vmatprep.mubr.msk.bf16.mxu1 %vm157_vm0, %v2383_v32  ;;  %v75_v31 = vld [vmem:[%s3268_s0 + $0x150] sm:$0xff] }
 0x235   :  { %2150 = vmatprep.mubr.msk.bf16.mxu0 %vm157_vm0, %v2383_v32  ;;  %v2238_v50 = vadd.f32 %v2682_v37, %v75_v31 }
 0x23b   :  { %2109 = vmatmul.mubr.msk.bf16.gmra.mrb[32].mxu1 %vm157_vm0, %v2384_v33 }
 0x23c   :  { %2151 = vmatmul.mubr.msk.bf16.gmra.mrb[32].mxu0 %vm157_vm0, %v2384_v33  ;;  %2112 = vmatprep.mubr.msk.bf16.mxu1 %vm157_vm0, %v2385_v34 }
 0x23d   :  { %2154 = vmatprep.mubr.msk.bf16.mxu0 %vm157_vm0, %v2385_v34  ;;  %v2170_v34 = vadd.f32 %v2682_v37, %v40_v18 }
 0x243   :  { %2113 = vmatmul.mubr.msk.bf16.gmra.mrb[36].mxu1 %vm157_vm0, %v2386_v35 }
 0x244   :  { %2155 = vmatmul.mubr.msk.bf16.gmra.mrb[36].mxu0 %vm157_vm0, %v2386_v35  ;;  %v2234_v35 = vadd.f32 %v2682_v37, %v72_v19 }
 0x2de   :  { %v2086_v55 = vpop.f32.mrb[8].mxu1 }
 0x2df   :  { %v2128_v57 = vpop.f32.mrb[8].mxu0  ;;  %v2159_v60 = vadd.f32 %v2158_v43, %v2086_v55  ;;  %v1171_v62 = vpop.f32.mrb[9].mxu1  ;;  %v2172_v43 = vadd.f32 %v2682_v37, %v38_v24  ;;  %v2176_v55 = vadd.f32 %v2682_v37, %v41_v36 }
 0x2e0   :  { %v2223_v61 = vadd.f32 %v2222_v44, %v2128_v57  ;;  %v1378_v63 = vpop.f32.mrb[9].mxu0  ;;  %v2161_v2 = vadd.f32 %v2160_v47, %v1171_v62  ;;  %v2087_v4 = vpop.f32.mrb[10].mxu1  ;;  %v2236_v44 = vadd.f32 %v2682_v37, %v70_v25  ;;  %v2240_v57 = vadd.f32 %v2682_v37, %v73_v38 }
 0x2e1   :  { %v2225_v3 = vadd.f32 %v2224_v48, %v1378_v63  ;;  %v2129_v5 = vpop.f32.mrb[10].mxu0  ;;  %v1578_v8 = vadd.f32 %v2159_v60, %v2726_v56  ;;  %v2163_v10 = vadd.f32 %v2162_v51, %v2087_v4  ;;  %v1174_v12 = vpop.f32.mrb[11].mxu1  ;;  %v44_v4 = vld [vmem:[%s3268_s0 + $0x58] sm:$0xff] }
 0x2e2   :  { %v1610_v9 = vadd.f32 %v2223_v61, %v2726_v56  ;;  %v2227_v11 = vadd.f32 %v2226_v52, %v2129_v5  ;;  %v1381_v13 = vpop.f32.mrb[11].mxu0  ;;  %v1576_v14 = vadd.f32 %v2161_v2, %v2726_v56  ;;  %v2165_v16 = vadd.f32 %v2164_v58, %v1174_v12  ;;  %v76_v5 = vld [vmem:[%s3268_s0 + $0x158] sm:$0xff] }
 0x2e3   :  { %v1608_v15 = vadd.f32 %v2225_v3, %v2726_v56  ;;  %v2229_v17 = vadd.f32 %v2228_v59, %v1381_v13  ;;  %v1642_v20 = vmax.f32 %v1578_v8, 0.0  ;;  %v1579_v22 = vadd.f32 %v2163_v10, %v2726_v56  ;;  %v42_v10 = vld [vmem:[%s3268_s0 + $0x48] sm:$0xff] }
 0x2e4   :  { %v1674_v21 = vmax.f32 %v1610_v9, 0.0  ;;  %v1611_v23 = vadd.f32 %v2227_v11, %v2726_v56  ;;  %v1640_v26 = vmax.f32 %v1576_v14, 0.0  ;;  %v1577_v28 = vadd.f32 %v2165_v16, %v2726_v56  ;;  %v74_v11 = vld [vmem:[%s3268_s0 + $0x148] sm:$0xff]  ;;  %v47_v16 = vld [vmem:[%s3268_s0 + $0x70] sm:$0xff] }
 0x2e5   :  { %v1672_v27 = vmax.f32 %v1608_v15, 0.0  ;;  %v1609_v29 = vadd.f32 %v2229_v17, %v2726_v56  ;;  %1707 = vst.msk [vmem:[%s3271_s9 + $0x10] sm:$0xff] %vm1704_vm4, %v1642_v20  ;;  %v1643_v32 = vmax.f32 %v1579_v22, 0.0  ;;  %v79_v17 = vld [vmem:[%s3268_s0 + $0x170] sm:$0xff]  ;;  %v2178_v20 = vadd.f32 %v2682_v37, %v44_v4  ;;  %v45_v22 = vld [vmem:[%s3268_s0 + $0x60] sm:$0xff] }
 0x2e6   :  { %1739 = vst.msk [vmem:[%s3271_s9 + $0x110] sm:$0xff] %vm1704_vm4, %v1674_v21  ;;  %v1675_v33 = vmax.f32 %v1611_v23, 0.0  ;;  %1705 = vst.msk [vmem:[%s3271_s9] sm:$0xff] %vm1704_vm4, %v1640_v26  ;;  %v1641_v39 = vmax.f32 %v1577_v28, 0.0  ;;  %v2090_v41 = vpop.f32.mrb[12].mxu1  ;;  %v2242_v21 = vadd.f32 %v2682_v37, %v76_v5  ;;  %v77_v23 = vld [vmem:[%s3268_s0 + $0x160] sm:$0xff]  ;;  %v2180_v28 = vadd.f32 %v2682_v37, %v42_v10 }
 0x2e7   :  { %1737 = vst.msk [vmem:[%s3271_s9 + $0x100] sm:$0xff] %vm1704_vm4, %v1672_v27  ;;  %v1673_v40 = vmax.f32 %v1609_v29, 0.0  ;;  %v2132_v42 = vpop.f32.mrb[12].mxu0  ;;  %1708 = vst.msk [vmem:[%s3271_s9 + $0x18] sm:$0xff] %vm1704_vm4, %v1643_v32  ;;  %v2167_v45 = vadd.f32 %v2166_v0, %v2090_v41  ;;  %v1187_v47 = vpop.f32.mrb[13].mxu1  ;;  %v2244_v29 = vadd.f32 %v2682_v37, %v74_v11  ;;  %v2184_v41 = vadd.f32 %v2682_v37, %v45_v22 }
 0x2e8   :  { %1740 = vst.msk [vmem:[%s3271_s9 + $0x118] sm:$0xff] %vm1704_vm4, %v1675_v33  ;;  %v2231_v46 = vadd.f32 %v2230_v1, %v2132_v42  ;;  %v1394_v48 = vpop.f32.mrb[13].mxu0  ;;  %1706 = vst.msk [vmem:[%s3271_s9 + $0x8] sm:$0xff] %vm1704_vm4, %v1641_v39  ;;  %v2169_v51 = vadd.f32 %v2168_v6, %v1187_v47  ;;  %v2091_v53 = vpop.f32.mrb[14].mxu1  ;;  %v2248_v42 = vadd.f32 %v2682_v37, %v77_v23 }
 0x2e9   :  { %1738 = vst.msk [vmem:[%s3271_s9 + $0x108] sm:$0xff] %vm1704_vm4, %v1673_v40  ;;  %v2233_v52 = vadd.f32 %v2232_v7, %v1394_v48  ;;  %v2133_v54 = vpop.f32.mrb[14].mxu0  ;;  %v1582_v58 = vadd.f32 %v2167_v45, %v2726_v56  ;;  %v2171_v60 = vadd.f32 %v2170_v34, %v2091_v53  ;;  %v1190_v62 = vpop.f32.mrb[15].mxu1  ;;  %v2182_v34 = vadd.f32 %v2682_v37, %v47_v16  ;;  %v48_v53 = vld [vmem:[%s3268_s0 + $0x78] sm:$0xff] }
 0x2ea   :  { %v1614_v59 = vadd.f32 %v2231_v46, %v2726_v56  ;;  %v2235_v61 = vadd.f32 %v2234_v35, %v2133_v54  ;;  %v1397_v63 = vpop.f32.mrb[15].mxu0  ;;  %v1580_v0 = vadd.f32 %v2169_v51, %v2726_v56  ;;  %v2173_v2 = vadd.f32 %v2172_v43, %v1190_v62  ;;  %v80_v54 = vld [vmem:[%s3268_s0 + $0x178] sm:$0xff] }
 0x2eb   :  { %v1612_v1 = vadd.f32 %v2233_v52, %v2726_v56  ;;  %v2237_v3 = vadd.f32 %v2236_v44, %v1397_v63  ;;  %v1646_v6 = vmax.f32 %v1582_v58, 0.0  ;;  %v1583_v8 = vadd.f32 %v2171_v60, %v2726_v56  ;;  %v46_v60 = vld [vmem:[%s3268_s0 + $0x68] sm:$0xff] }
 0x2ec   :  { %v1678_v7 = vmax.f32 %v1614_v59, 0.0  ;;  %v1615_v9 = vadd.f32 %v2235_v61, %v2726_v56  ;;  %v1644_v12 = vmax.f32 %v1580_v0, 0.0  ;;  %v1581_v14 = vadd.f32 %v2173_v2, %v2726_v56  ;;  %v78_v61 = vld [vmem:[%s3268_s0 + $0x168] sm:$0xff]  ;;  %v51_v2 = vld [vmem:[%s3268_s0 + $0x90] sm:$0xff] }
 0x2ed   :  { %v1676_v13 = vmax.f32 %v1612_v1, 0.0  ;;  %v1613_v15 = vadd.f32 %v2237_v3, %v2726_v56  ;;  %1711 = vst.msk [vmem:[%s3271_s9 + $0x30] sm:$0xff] %vm1704_vm4, %v1646_v6  ;;  %v1647_v18 = vmax.f32 %v1583_v8, 0.0  ;;  %v2246_v35 = vadd.f32 %v2682_v37, %v79_v17  ;;  %v83_v3 = vld [vmem:[%s3268_s0 + $0x190] sm:$0xff]  ;;  %v49_v8 = vld [vmem:[%s3268_s0 + $0x80] sm:$0xff] }
 0x2ee   :  { %1743 = vst.msk [vmem:[%s3271_s9 + $0x130] sm:$0xff] %vm1704_vm4, %v1678_v7  ;;  %v1679_v19 = vmax.f32 %v1615_v9, 0.0  ;;  %1709 = vst.msk [vmem:[%s3271_s9 + $0x20] sm:$0xff] %vm1704_vm4, %v1644_v12  ;;  %v1645_v24 = vmax.f32 %v1581_v14, 0.0  ;;  %v2094_v26 = vpop.f32.mrb[16].mxu1  ;;  %v2186_v6 = vadd.f32 %v2682_v37, %v48_v53  ;;  %v2250_v7 = vadd.f32 %v2682_v37, %v80_v54  ;;  %v81_v9 = vld [vmem:[%s3268_s0 + $0x180] sm:$0xff] }
 0x2ef   :  { %1741 = vst.msk [vmem:[%s3271_s9 + $0x120] sm:$0xff] %vm1704_vm4, %v1676_v13  ;;  %v1677_v25 = vmax.f32 %v1613_v15, 0.0  ;;  %v2136_v27 = vpop.f32.mrb[16].mxu0  ;;  %1712 = vst.msk [vmem:[%s3271_s9 + $0x38] sm:$0xff] %vm1704_vm4, %v1647_v18  ;;  %v2175_v30 = vadd.f32 %v2174_v49, %v2094_v26  ;;  %v1203_v32 = vpop.f32.mrb[17].mxu1  ;;  %v2188_v14 = vadd.f32 %v2682_v37, %v46_v60  ;;  %v2252_v15 = vadd.f32 %v2682_v37, %v78_v61 }
 0x2f0   :  { %1744 = vst.msk [vmem:[%s3271_s9 + $0x138] sm:$0xff] %vm1704_vm4, %v1679_v19  ;;  %v2239_v31 = vadd.f32 %v2238_v50, %v2136_v27  ;;  %v1410_v33 = vpop.f32.mrb[17].mxu0  ;;  %1710 = vst.msk [vmem:[%s3271_s9 + $0x28] sm:$0xff] %vm1704_vm4, %v1645_v24  ;;  %v2177_v36 = vadd.f32 %v2176_v55, %v1203_v32  ;;  %v2095_v39 = vpop.f32.mrb[18].mxu1  ;;  %v2192_v26 = vadd.f32 %v2682_v37, %v49_v8 }
 0x2f1   :  { %1742 = vst.msk [vmem:[%s3271_s9 + $0x128] sm:$0xff] %vm1704_vm4, %v1677_v25  ;;  %v2241_v38 = vadd.f32 %v2240_v57, %v1410_v33  ;;  %v2137_v40 = vpop.f32.mrb[18].mxu0  ;;  %v1586_v43 = vadd.f32 %v2175_v30, %v2726_v56  ;;  %v2179_v45 = vadd.f32 %v2178_v20, %v2095_v39  ;;  %v1206_v47 = vpop.f32.mrb[19].mxu1  ;;  %v2190_v20 = vadd.f32 %v2682_v37, %v51_v2  ;;  %v52_v39 = vld [vmem:[%s3268_s0 + $0x98] sm:$0xff] }
 0x2f2   :  { %v1618_v44 = vadd.f32 %v2239_v31, %v2726_v56  ;;  %v2243_v46 = vadd.f32 %v2242_v21, %v2137_v40  ;;  %v1413_v48 = vpop.f32.mrb[19].mxu0  ;;  %v1584_v49 = vadd.f32 %v2177_v36, %v2726_v56  ;;  %v2181_v51 = vadd.f32 %v2180_v28, %v1206_v47  ;;  %v84_v40 = vld [vmem:[%s3268_s0 + $0x198] sm:$0xff] }
 0x2f3   :  { %v1616_v50 = vadd.f32 %v2241_v38, %v2726_v56  ;;  %v2245_v52 = vadd.f32 %v2244_v29, %v1413_v48  ;;  %v1650_v55 = vmax.f32 %v1586_v43, 0.0  ;;  %v1587_v58 = vadd.f32 %v2179_v45, %v2726_v56  ;;  %v50_v45 = vld [vmem:[%s3268_s0 + $0x88] sm:$0xff] }
 0x2f4   :  { %v1682_v57 = vmax.f32 %v1618_v44, 0.0  ;;  %v1619_v59 = vadd.f32 %v2243_v46, %v2726_v56  ;;  %v1648_v62 = vmax.f32 %v1584_v49, 0.0  ;;  %v1585_v0 = vadd.f32 %v2181_v51, %v2726_v56  ;;  %v82_v46 = vld [vmem:[%s3268_s0 + $0x188] sm:$0xff]  ;;  %v55_v51 = vld [vmem:[%s3268_s0 + $0xb0] sm:$0xff] }
 0x2f5   :  { %v1680_v63 = vmax.f32 %v1616_v50, 0.0  ;;  %v1617_v1 = vadd.f32 %v2245_v52, %v2726_v56  ;;  %1715 = vst.msk [vmem:[%s3271_s9 + $0x50] sm:$0xff] %vm1704_vm4, %v1650_v55  ;;  %v1651_v4 = vmax.f32 %v1587_v58, 0.0  ;;  %v2254_v21 = vadd.f32 %v2682_v37, %v83_v3  ;;  %v87_v52 = vld [vmem:[%s3268_s0 + $0x1b0] sm:$0xff]  ;;  %v53_v58 = vld [vmem:[%s3268_s0 + $0xa0] sm:$0xff] }
 0x2f6   :  { %1747 = vst.msk [vmem:[%s3271_s9 + $0x150] sm:$0xff] %vm1704_vm4, %v1682_v57  ;;  %v1683_v5 = vmax.f32 %v1619_v59, 0.0  ;;  %1713 = vst.msk [vmem:[%s3271_s9 + $0x40] sm:$0xff] %vm1704_vm4, %v1648_v62  ;;  %v1649_v10 = vmax.f32 %v1585_v0, 0.0  ;;  %v2098_v12 = vpop.f32.mrb[20].mxu1  ;;  %v2256_v27 = vadd.f32 %v2682_v37, %v81_v9  ;;  %v2194_v55 = vadd.f32 %v2682_v37, %v52_v39  ;;  %v85_v59 = vld [vmem:[%s3268_s0 + $0x1a0] sm:$0xff] }
 0x2f7   :  { %1745 = vst.msk [vmem:[%s3271_s9 + $0x140] sm:$0xff] %vm1704_vm4, %v1680_v63  ;;  %v1681_v11 = vmax.f32 %v1617_v1, 0.0  ;;  %v2140_v13 = vpop.f32.mrb[20].mxu0  ;;  %1716 = vst.msk [vmem:[%s3271_s9 + $0x58] sm:$0xff] %vm1704_vm4, %v1651_v4  ;;  %v2183_v16 = vadd.f32 %v2182_v34, %v2098_v12  ;;  %v1219_v18 = vpop.f32.mrb[21].mxu1  ;;  %v2258_v57 = vadd.f32 %v2682_v37, %v84_v40  ;;  %v2196_v0 = vadd.f32 %v2682_v37, %v50_v45 }
 0x2f8   :  { %1748 = vst.msk [vmem:[%s3271_s9 + $0x158] sm:$0xff] %vm1704_vm4, %v1683_v5  ;;  %v2247_v17 = vadd.f32 %v2246_v35, %v2140_v13  ;;  %v1426_v19 = vpop.f32.mrb[21].mxu0  ;;  %1714 = vst.msk [vmem:[%s3271_s9 + $0x48] sm:$0xff] %vm1704_vm4, %v1649_v10  ;;  %v2185_v22 = vadd.f32 %v2184_v41, %v1219_v18  ;;  %v2099_v24 = vpop.f32.mrb[22].mxu1  ;;  %v2260_v1 = vadd.f32 %v2682_v37, %v82_v46 }
 0x2f9   :  { %1746 = vst.msk [vmem:[%s3271_s9 + $0x148] sm:$0xff] %vm1704_vm4, %v1681_v11  ;;  %v2249_v23 = vadd.f32 %v2248_v42, %v1426_v19  ;;  %v2141_v25 = vpop.f32.mrb[22].mxu0  ;;  %v1590_v28 = vadd.f32 %v2183_v16, %v2726_v56  ;;  %v2187_v30 = vadd.f32 %v2186_v6, %v2099_v24  ;;  %v1222_v32 = vpop.f32.mrb[23].mxu1  ;;  %v2198_v6 = vadd.f32 %v2682_v37, %v55_v51  ;;  %v56_v24 = vld [vmem:[%s3268_s0 + $0xb8] sm:$0xff] }
 0x2fa   :  { %v1622_v29 = vadd.f32 %v2247_v17, %v2726_v56  ;;  %v2251_v31 = vadd.f32 %v2250_v7, %v2141_v25  ;;  %v1429_v33 = vpop.f32.mrb[23].mxu0  ;;  %v1588_v34 = vadd.f32 %v2185_v22, %v2726_v56  ;;  %v2189_v36 = vadd.f32 %v2188_v14, %v1222_v32  ;;  %v88_v25 = vld [vmem:[%s3268_s0 + $0x1b8] sm:$0xff] }
 0x2fb   :  { %v1620_v35 = vadd.f32 %v2249_v23, %v2726_v56  ;;  %v2253_v38 = vadd.f32 %v2252_v15, %v1429_v33  ;;  %v1654_v41 = vmax.f32 %v1590_v28, 0.0  ;;  %v1591_v43 = vadd.f32 %v2187_v30, %v2726_v56  ;;  %v54_v30 = vld [vmem:[%s3268_s0 + $0xa8] sm:$0xff] }
 0x2fc   :  { %v1686_v42 = vmax.f32 %v1622_v29, 0.0  ;;  %v1623_v44 = vadd.f32 %v2251_v31, %v2726_v56  ;;  %v1652_v47 = vmax.f32 %v1588_v34, 0.0  ;;  %v1589_v49 = vadd.f32 %v2189_v36, %v2726_v56  ;;  %v86_v31 = vld [vmem:[%s3268_s0 + $0x1a8] sm:$0xff]  ;;  %v59_v36 = vld [vmem:[%s3268_s0 + $0xd0] sm:$0xff] }
 0x2fd   :  { %v1684_v48 = vmax.f32 %v1620_v35, 0.0  ;;  %v1621_v50 = vadd.f32 %v2253_v38, %v2726_v56  ;;  %1719 = vst.msk [vmem:[%s3271_s9 + $0x70] sm:$0xff] %vm1704_vm4, %v1654_v41  ;;  %v1655_v53 = vmax.f32 %v1591_v43, 0.0  ;;  %v2262_v7 = vadd.f32 %v2682_v37, %v87_v52  ;;  %v91_v38 = vld [vmem:[%s3268_s0 + $0x1d0] sm:$0xff]  ;;  %v57_v43 = vld [vmem:[%s3268_s0 + $0xc0] sm:$0xff] }
 0x2fe   :  { %1751 = vst.msk [vmem:[%s3271_s9 + $0x170] sm:$0xff] %vm1704_vm4, %v1686_v42  ;;  %v1687_v54 = vmax.f32 %v1623_v44, 0.0  ;;  %1717 = vst.msk [vmem:[%s3271_s9 + $0x60] sm:$0xff] %vm1704_vm4, %v1652_v47  ;;  %v1653_v60 = vmax.f32 %v1589_v49, 0.0  ;;  %v2102_v62 = vpop.f32.mrb[24].mxu1  ;;  %v2200_v12 = vadd.f32 %v2682_v37, %v53_v58  ;;  %v2264_v13 = vadd.f32 %v2682_v37, %v85_v59  ;;  %v89_v44 = vld [vmem:[%s3268_s0 + $0x1c0] sm:$0xff] }
 0x2ff   :  { %1749 = vst.msk [vmem:[%s3271_s9 + $0x160] sm:$0xff] %vm1704_vm4, %v1684_v48  ;;  %v1685_v61 = vmax.f32 %v1621_v50, 0.0  ;;  %v2144_v63 = vpop.f32.mrb[24].mxu0  ;;  %1720 = vst.msk [vmem:[%s3271_s9 + $0x78] sm:$0xff] %vm1704_vm4, %v1655_v53  ;;  %v2191_v2 = vadd.f32 %v2190_v20, %v2102_v62  ;;  %v1235_v4 = vpop.f32.mrb[25].mxu1  ;;  %v2202_v41 = vadd.f32 %v2682_v37, %v56_v24  ;;  %v2266_v42 = vadd.f32 %v2682_v37, %v88_v25 }
 0x300   :  { %1752 = vst.msk [vmem:[%s3271_s9 + $0x178] sm:$0xff] %vm1704_vm4, %v1687_v54  ;;  %v2255_v3 = vadd.f32 %v2254_v21, %v2144_v63  ;;  %v1442_v5 = vpop.f32.mrb[25].mxu0  ;;  %1718 = vst.msk [vmem:[%s3271_s9 + $0x68] sm:$0xff] %vm1704_vm4, %v1653_v60  ;;  %v2193_v8 = vadd.f32 %v2192_v26, %v1235_v4  ;;  %v2103_v10 = vpop.f32.mrb[26].mxu1  ;;  %v2204_v49 = vadd.f32 %v2682_v37, %v54_v30 }
 0x301   :  { %1750 = vst.msk [vmem:[%s3271_s9 + $0x168] sm:$0xff] %vm1704_vm4, %v1685_v61  ;;  %v2257_v9 = vadd.f32 %v2256_v27, %v1442_v5  ;;  %v2145_v11 = vpop.f32.mrb[26].mxu0  ;;  %v1594_v14 = vadd.f32 %v2191_v2, %v2726_v56  ;;  %v2195_v16 = vadd.f32 %v2194_v55, %v2103_v10  ;;  %v1238_v18 = vpop.f32.mrb[27].mxu1  ;;  %v2268_v50 = vadd.f32 %v2682_v37, %v86_v31  ;;  %v60_v10 = vld [vmem:[%s3268_s0 + $0xd8] sm:$0xff] }
 0x302   :  { %v1626_v15 = vadd.f32 %v2255_v3, %v2726_v56  ;;  %v2259_v17 = vadd.f32 %v2258_v57, %v2145_v11  ;;  %v1445_v19 = vpop.f32.mrb[27].mxu0  ;;  %v1592_v20 = vadd.f32 %v2193_v8, %v2726_v56  ;;  %v2197_v22 = vadd.f32 %v2196_v0, %v1238_v18  ;;  %v92_v11 = vld [vmem:[%s3268_s0 + $0x1d8] sm:$0xff] }
 0x303   :  { %v1624_v21 = vadd.f32 %v2257_v9, %v2726_v56  ;;  %v2261_v23 = vadd.f32 %v2260_v1, %v1445_v19  ;;  %v1658_v26 = vmax.f32 %v1594_v14, 0.0  ;;  %v1595_v28 = vadd.f32 %v2195_v16, %v2726_v56  ;;  %v58_v16 = vld [vmem:[%s3268_s0 + $0xc8] sm:$0xff] }
 0x304   :  { %v1690_v27 = vmax.f32 %v1626_v15, 0.0  ;;  %v1627_v29 = vadd.f32 %v2259_v17, %v2726_v56  ;;  %v1656_v32 = vmax.f32 %v1592_v20, 0.0  ;;  %v1593_v34 = vadd.f32 %v2197_v22, %v2726_v56  ;;  %v90_v17 = vld [vmem:[%s3268_s0 + $0x1c8] sm:$0xff]  ;;  %v63_v22 = vld [vmem:[%s3268_s0 + $0xf0] sm:$0xff] }
 0x305   :  { %v1688_v33 = vmax.f32 %v1624_v21, 0.0  ;;  %v1625_v35 = vadd.f32 %v2261_v23, %v2726_v56  ;;  %1723 = vst.msk [vmem:[%s3271_s9 + $0x90] sm:$0xff] %vm1704_vm4, %v1658_v26  ;;  %v1659_v39 = vmax.f32 %v1595_v28, 0.0  ;;  %v2206_v55 = vadd.f32 %v2682_v37, %v59_v36  ;;  %v95_v23 = vld [vmem:[%s3268_s0 + $0x1f0] sm:$0xff]  ;;  %v61_v28 = vld [vmem:[%s3268_s0 + $0xe0] sm:$0xff] }
 0x306   :  { %1755 = vst.msk [vmem:[%s3271_s9 + $0x190] sm:$0xff] %vm1704_vm4, %v1690_v27  ;;  %v1691_v40 = vmax.f32 %v1627_v29, 0.0  ;;  %1721 = vst.msk [vmem:[%s3271_s9 + $0x80] sm:$0xff] %vm1704_vm4, %v1656_v32  ;;  %v1657_v45 = vmax.f32 %v1593_v34, 0.0  ;;  %v2106_v47 = vpop.f32.mrb[28].mxu1  ;;  %v2270_v57 = vadd.f32 %v2682_v37, %v91_v38  ;;  %v2208_v62 = vadd.f32 %v2682_v37, %v57_v43  ;;  %v93_v29 = vld [vmem:[%s3268_s0 + $0x1e0] sm:$0xff] }
 0x307   :  { %1753 = vst.msk [vmem:[%s3271_s9 + $0x180] sm:$0xff] %vm1704_vm4, %v1688_v33  ;;  %v1689_v46 = vmax.f32 %v1625_v35, 0.0  ;;  %v2148_v48 = vpop.f32.mrb[28].mxu0  ;;  %1724 = vst.msk [vmem:[%s3271_s9 + $0x98] sm:$0xff] %vm1704_vm4, %v1659_v39  ;;  %v2199_v51 = vadd.f32 %v2198_v6, %v2106_v47  ;;  %v1251_v53 = vpop.f32.mrb[29].mxu1  ;;  %v2272_v63 = vadd.f32 %v2682_v37, %v89_v44  ;;  %v2210_v26 = vadd.f32 %v2682_v37, %v60_v10 }
 0x308   :  { %1756 = vst.msk [vmem:[%s3271_s9 + $0x198] sm:$0xff] %vm1704_vm4, %v1691_v40  ;;  %v2263_v52 = vadd.f32 %v2262_v7, %v2148_v48  ;;  %v1458_v54 = vpop.f32.mrb[29].mxu0  ;;  %1722 = vst.msk [vmem:[%s3271_s9 + $0x88] sm:$0xff] %vm1704_vm4, %v1657_v45  ;;  %v2201_v58 = vadd.f32 %v2200_v12, %v1251_v53  ;;  %v2107_v60 = vpop.f32.mrb[30].mxu1  ;;  %v2274_v27 = vadd.f32 %v2682_v37, %v92_v11 }
 0x309   :  { %1754 = vst.msk [vmem:[%s3271_s9 + $0x188] sm:$0xff] %vm1704_vm4, %v1689_v46  ;;  %v2265_v59 = vadd.f32 %v2264_v13, %v1458_v54  ;;  %v2149_v61 = vpop.f32.mrb[30].mxu0  ;;  %v1598_v0 = vadd.f32 %v2199_v51, %v2726_v56  ;;  %v2203_v2 = vadd.f32 %v2202_v41, %v2107_v60  ;;  %v1254_v4 = vpop.f32.mrb[31].mxu1  ;;  %v2212_v34 = vadd.f32 %v2682_v37, %v58_v16  ;;  %v64_v60 = vld [vmem:[%s3268_s0 + $0xf8] sm:$0xff] }
 0x30a   :  { %v1630_v1 = vadd.f32 %v2263_v52, %v2726_v56  ;;  %v2267_v3 = vadd.f32 %v2266_v42, %v2149_v61  ;;  %v1461_v5 = vpop.f32.mrb[31].mxu0  ;;  %v1596_v6 = vadd.f32 %v2201_v58, %v2726_v56  ;;  %v2205_v8 = vadd.f32 %v2204_v49, %v1254_v4  ;;  %v96_v61 = vld [vmem:[%s3268_s0 + $0x1f8] sm:$0xff] }
 0x30b   :  { %v1628_v7 = vadd.f32 %v2265_v59, %v2726_v56  ;;  %v2269_v9 = vadd.f32 %v2268_v50, %v1461_v5  ;;  %v1662_v12 = vmax.f32 %v1598_v0, 0.0  ;;  %v1599_v14 = vadd.f32 %v2203_v2, %v2726_v56  ;;  %v62_v2 = vld [vmem:[%s3268_s0 + $0xe8] sm:$0xff] }
 0x30c   :  { %v1694_v13 = vmax.f32 %v1630_v1, 0.0  ;;  %v1631_v15 = vadd.f32 %v2267_v3, %v2726_v56  ;;  %v1660_v18 = vmax.f32 %v1596_v6, 0.0  ;;  %v1597_v20 = vadd.f32 %v2205_v8, %v2726_v56  ;;  %v94_v3 = vld [vmem:[%s3268_s0 + $0x1e8] sm:$0xff] }
 0x30d   :  { %v1692_v19 = vmax.f32 %v1628_v7, 0.0  ;;  %v1629_v21 = vadd.f32 %v2269_v9, %v2726_v56  ;;  %1727 = vst.msk [vmem:[%s3271_s9 + $0xb0] sm:$0xff] %vm1704_vm4, %v1662_v12  ;;  %v1663_v24 = vmax.f32 %v1599_v14, 0.0  ;;  %v2276_v35 = vadd.f32 %v2682_v37, %v90_v17 }
 0x30e   :  { %1759 = vst.msk [vmem:[%s3271_s9 + $0x1b0] sm:$0xff] %vm1704_vm4, %v1694_v13  ;;  %v1695_v25 = vmax.f32 %v1631_v15, 0.0  ;;  %1725 = vst.msk [vmem:[%s3271_s9 + $0xa0] sm:$0xff] %vm1704_vm4, %v1660_v18  ;;  %v1661_v30 = vmax.f32 %v1597_v20, 0.0  ;;  %v2110_v32 = vpop.f32.mrb[32].mxu1  ;;  %v2214_v41 = vadd.f32 %v2682_v37, %v63_v22  ;;  %v2278_v42 = vadd.f32 %v2682_v37, %v95_v23 }
 0x30f   :  { %1757 = vst.msk [vmem:[%s3271_s9 + $0x1a0] sm:$0xff] %vm1704_vm4, %v1692_v19  ;;  %v1693_v31 = vmax.f32 %v1629_v21, 0.0  ;;  %v2152_v33 = vpop.f32.mrb[32].mxu0  ;;  %1728 = vst.msk [vmem:[%s3271_s9 + $0xb8] sm:$0xff] %vm1704_vm4, %v1663_v24  ;;  %v2207_v36 = vadd.f32 %v2206_v55, %v2110_v32  ;;  %v1267_v39 = vpop.f32.mrb[33].mxu1  ;;  %v2216_v47 = vadd.f32 %v2682_v37, %v61_v28  ;;  %v2280_v48 = vadd.f32 %v2682_v37, %v93_v29 }
 0x310   :  { %1760 = vst.msk [vmem:[%s3271_s9 + $0x1b8] sm:$0xff] %vm1704_vm4, %v1695_v25  ;;  %v2271_v38 = vadd.f32 %v2270_v57, %v2152_v33  ;;  %v1474_v40 = vpop.f32.mrb[33].mxu0  ;;  %1726 = vst.msk [vmem:[%s3271_s9 + $0xa8] sm:$0xff] %vm1704_vm4, %v1661_v30  ;;  %v2209_v43 = vadd.f32 %v2208_v62, %v1267_v39  ;;  %v2111_v45 = vpop.f32.mrb[34].mxu1  ;;  %v2218_v10 = vadd.f32 %v2682_v37, %v64_v60 }
 0x311   :  { %1758 = vst.msk [vmem:[%s3271_s9 + $0x1a8] sm:$0xff] %vm1704_vm4, %v1693_v31  ;;  %v2273_v44 = vadd.f32 %v2272_v63, %v1474_v40  ;;  %v2153_v46 = vpop.f32.mrb[34].mxu0  ;;  %v1602_v49 = vadd.f32 %v2207_v36, %v2726_v56  ;;  %v2211_v51 = vadd.f32 %v2210_v26, %v2111_v45  ;;  %v1270_v53 = vpop.f32.mrb[35].mxu1  ;;  %v2282_v11 = vadd.f32 %v2682_v37, %v96_v61 }
 0x312   :  { %v1634_v50 = vadd.f32 %v2271_v38, %v2726_v56  ;;  %v2275_v52 = vadd.f32 %v2274_v27, %v2153_v46  ;;  %v1477_v54 = vpop.f32.mrb[35].mxu0  ;;  %v1600_v55 = vadd.f32 %v2209_v43, %v2726_v56  ;;  %v2213_v58 = vadd.f32 %v2212_v34, %v1270_v53 }
 0x313   :  { %v1632_v57 = vadd.f32 %v2273_v44, %v2726_v56  ;;  %v2277_v59 = vadd.f32 %v2276_v35, %v1477_v54  ;;  %v1666_v62 = vmax.f32 %v1602_v49, 0.0  ;;  %v1603_v0 = vadd.f32 %v2211_v51, %v2726_v56 }
 0x314   :  { %v1698_v63 = vmax.f32 %v1634_v50, 0.0  ;;  %v1635_v1 = vadd.f32 %v2275_v52, %v2726_v56  ;;  %v1664_v4 = vmax.f32 %v1600_v55, 0.0  ;;  %v1601_v6 = vadd.f32 %v2213_v58, %v2726_v56 }
 0x315   :  { %v1696_v5 = vmax.f32 %v1632_v57, 0.0  ;;  %v1633_v7 = vadd.f32 %v2277_v59, %v2726_v56  ;;  %1731 = vst.msk [vmem:[%s3271_s9 + $0xd0] sm:$0xff] %vm1704_vm4, %v1666_v62  ;;  %v1667_v8 = vmax.f32 %v1603_v0, 0.0  ;;  %v2220_v16 = vadd.f32 %v2682_v37, %v62_v2 }
 0x316   :  { %1763 = vst.msk [vmem:[%s3271_s9 + $0x1d0] sm:$0xff] %vm1704_vm4, %v1698_v63  ;;  %v1699_v9 = vmax.f32 %v1635_v1, 0.0  ;;  %1729 = vst.msk [vmem:[%s3271_s9 + $0xc0] sm:$0xff] %vm1704_vm4, %v1664_v4  ;;  %v1665_v12 = vmax.f32 %v1601_v6, 0.0  ;;  %v2114_v14 = vpop.f32.mrb[36].mxu1  ;;  %v2284_v17 = vadd.f32 %v2682_v37, %v94_v3 }
 0x317   :  { %1761 = vst.msk [vmem:[%s3271_s9 + $0x1c0] sm:$0xff] %vm1704_vm4, %v1696_v5  ;;  %v1697_v13 = vmax.f32 %v1633_v7, 0.0  ;;  %v2156_v15 = vpop.f32.mrb[36].mxu0  ;;  %1732 = vst.msk [vmem:[%s3271_s9 + $0xd8] sm:$0xff] %vm1704_vm4, %v1667_v8  ;;  %v2215_v18 = vadd.f32 %v2214_v41, %v2114_v14  ;;  %v1283_v20 = vpop.f32.mrb[37].mxu1 }
 0x318   :  { %1764 = vst.msk [vmem:[%s3271_s9 + $0x1d8] sm:$0xff] %vm1704_vm4, %v1699_v9  ;;  %v2279_v19 = vadd.f32 %v2278_v42, %v2156_v15  ;;  %v1490_v21 = vpop.f32.mrb[37].mxu0  ;;  %1730 = vst.msk [vmem:[%s3271_s9 + $0xc8] sm:$0xff] %vm1704_vm4, %v1665_v12  ;;  %v2217_v37 = vadd.f32 %v2216_v47, %v1283_v20  ;;  %v2115_v23 = vpop.f32.mrb[38].mxu1 }
 0x319   :  { %1762 = vst.msk [vmem:[%s3271_s9 + $0x1c8] sm:$0xff] %vm1704_vm4, %v1697_v13  ;;  %v2281_v22 = vadd.f32 %v2280_v48, %v1490_v21  ;;  %v2157_v24 = vpop.f32.mrb[38].mxu0  ;;  %v1606_v25 = vadd.f32 %v2215_v18, %v2726_v56  ;;  %v2219_v27 = vadd.f32 %v2218_v10, %v2115_v23  ;;  %v1286_v29 = vpop.f32.mrb[39].mxu1 }
 0x31a   :  { %v1638_v26 = vadd.f32 %v2279_v19, %v2726_v56  ;;  %v2283_v28 = vadd.f32 %v2282_v11, %v2157_v24  ;;  %v1493_v30 = vpop.f32.mrb[39].mxu0  ;;  %v1604_v31 = vadd.f32 %v2217_v37, %v2726_v56  ;;  %v2221_v33 = vadd.f32 %v2220_v16, %v1286_v29 }
 0x31b   :  { %v1636_v32 = vadd.f32 %v2281_v22, %v2726_v56  ;;  %v2285_v34 = vadd.f32 %v2284_v17, %v1493_v30  ;;  %v1670_v35 = vmax.f32 %v1606_v25, 0.0  ;;  %v1607_v38 = vadd.f32 %v2219_v27, %v2726_v56 }
 0x31c   :  { %v1702_v36 = vmax.f32 %v1638_v26, 0.0  ;;  %v1639_v39 = vadd.f32 %v2283_v28, %v2726_v56  ;;  %v1668_v40 = vmax.f32 %v1604_v31, 0.0  ;;  %v1605_v42 = vadd.f32 %v2221_v33, %v2726_v56 }
 0x31d   :  { %v1700_v41 = vmax.f32 %v1636_v32, 0.0  ;;  %v1637_v43 = vadd.f32 %v2285_v34, %v2726_v56  ;;  %1735 = vst.msk [vmem:[%s3271_s9 + $0xf0] sm:$0xff] %vm1704_vm4, %v1670_v35  ;;  %v1671_v44 = vmax.f32 %v1607_v38, 0.0 }
 0x31e   :  { %1767 = vst.msk [vmem:[%s3271_s9 + $0x1f0] sm:$0xff] %vm1704_vm4, %v1702_v36  ;;  %v1703_v45 = vmax.f32 %v1639_v39, 0.0  ;;  %1733 = vst.msk [vmem:[%s3271_s9 + $0xe0] sm:$0xff] %vm1704_vm4, %v1668_v40  ;;  %v1669_v56 = vmax.f32 %v1605_v42, 0.0 }
 0x31f   :  { %1765 = vst.msk [vmem:[%s3271_s9 + $0x1e0] sm:$0xff] %vm1704_vm4, %v1700_v41  ;;  %v1701_v46 = vmax.f32 %v1637_v43, 0.0  ;;  %1736 = vst.msk [vmem:[%s3271_s9 + $0xf8] sm:$0xff] %vm1704_vm4, %v1671_v44 }
 0x320   :  { %1768 = vst.msk [vmem:[%s3271_s9 + $0x1f8] sm:$0xff] %vm1704_vm4, %v1703_v45  ;;  %1734 = vst.msk [vmem:[%s3271_s9 + $0xe8] sm:$0xff] %vm1704_vm4, %v1669_v56 }
 0x321   :  { %1766 = vst.msk [vmem:[%s3271_s9 + $0x1e8] sm:$0xff] %vm1704_vm4, %v1701_v46 }

</bundles_post_ra>
